<compile_context>
chip_gen: v6e
topology: v6e:2x2x1
jax: 0.10.0
libtpu: 0.0.40
codegen_flags: <defaults>
</compile_context>

<pallas_src>
import functools

import jax
import jax.numpy as jnp
from jax.experimental import pallas as pl
from jax.experimental.pallas import tpu as pltpu


def _conv1x1_kernel(x_ref, w_ref, b_ref, o_ref):
    # x_ref: (C_in, t)     activation tile, pixels on the 128-wide lane axis
    # w_ref: (t_co, C_in)  weight tile (constant index when C_out not tiled)
    # b_ref: (t_co, 1)     bias tile, f32
    # o_ref: (t_co, t)     lane-dense output tile
    acc = jnp.dot(w_ref[...], x_ref[...], preferred_element_type=jnp.float32)
    o_ref[...] = (acc + b_ref[...]).astype(o_ref.dtype)


@functools.lru_cache(maxsize=1)
def _pipeline_mode_supported():
    """True if pl.BlockSpec accepts pipeline_mode=pl.Buffered(k)."""
    if not hasattr(pl, "Buffered"):
        return False
    try:
        pl.BlockSpec((8, 128), lambda i, j: (i, j), pipeline_mode=pl.Buffered(1))
        return True
    except Exception:
        return False


@functools.lru_cache(maxsize=1)
def _vmem_capacity_bytes():
    """Physical VMEM per TensorCore; conservative 64 MiB (v7x) fallback."""
    try:
        info = pltpu.get_tpu_info()
        for attr in ("vmem_capacity_bytes", "vmem_size_bytes", "vmem_bytes"):
            cap = getattr(info, attr, None)
            if cap:
                return int(cap)
    except Exception:
        pass
    return 64 * 1024 * 1024


def _prefer_divisor_of(t, hw):
    """Largest multiple of 128 in (t/2, t] that divides hw exactly, so every
    output store is an unmasked, lane-dense vst (no ragged tail tile)."""
    if t < 128 or hw % 128 != 0:
        return t
    lo = max(128, t // 2)
    for cand in range(t, lo - 1, -128):
        if hw % cand == 0:
            return cand
    return t


def conv_connector_forward(x_nchw, weight, bias, *, t_hw=2048,
                           vmem_budget_bytes=None, compute_dtype=None):
    """1x1 conv forward (ConvConnector).

    x_nchw: (N, C_in, H, W)
    weight: (C_out, C_in)   -- squeezed from PyTorch's (C_out, C_in, 1, 1)
    bias:   (C_out,)
    returns (N, C_out, H, W) in x_nchw.dtype

    t_hw:          target pixel-tile width (lane axis), rounded to 128s.
    compute_dtype: optionally cast x/w (e.g. jnp.bfloat16) for HBM traffic and
                   the MXU; accumulation + bias add stay f32 (accuracy tradeoff,
                   off by default).
    """
    N, C_in, H, W = x_nchw.shape
    C_out = weight.shape[0]
    HW = H * W
    out_dtype = x_nchw.dtype

    # Free reshape: NCHW row-major == (N, C, H*W). No transpose, no copy.
    x = x_nchw.reshape(N, C_in, HW)
    if compute_dtype is not None:
        x = x.astype(compute_dtype)
        w = weight.astype(compute_dtype)
    else:
        w = weight.astype(x.dtype)
    b = bias.reshape(C_out, 1).astype(jnp.float32)

    x_isz = jnp.dtype(x.dtype).itemsize
    w_isz = jnp.dtype(w.dtype).itemsize
    o_isz = jnp.dtype(out_dtype).itemsize

    # --- generation-aware VMEM budgeting ------------------------------------
    vmem_cap = _vmem_capacity_bytes()                # 128 MiB v5e/v6e, 64 MiB v7x
    limit_cap = max(vmem_cap - (8 << 20), 16 << 20)  # headroom for Mosaic scratch
    budget = int(limit_cap * 0.85) if vmem_budget_bytes is None else vmem_budget_bytes

    # --- output-channel tiling (only when the weight is too big) ------------
    full_w_bytes = C_out * C_in * w_isz
    if C_out <= 256 or full_w_bytes <= budget // 3:
        t_co, n_co = C_out, 1
    else:
        # Multiples of 256 keep the 256x256 MXUs (v6e/v7x) fully fed.
        t_co = 256
        while (t_co + 256 <= C_out
               and 2 * (t_co + 256) * C_in * w_isz <= budget // 3):
            t_co += 256
        n_co = pl.cdiv(C_out, t_co)

    # Constant-index blocks are never re-fetched; their second pipeline buffer
    # is pure VMEM waste, so single-buffer them when the saving is material.
    single_buffer_consts = (n_co == 1 and full_w_bytes >= (1 << 20)
                            and _pipeline_mode_supported())
    w_bufs = 1 if single_buffer_consts else 2

    # --- pixel tile width (lane axis) ---------------------------------------
    if HW < 128:
        t = HW
    else:
        t = max((min(t_hw, HW) // 128) * 128, 128)
        t = _prefer_divisor_of(t, HW)

    def _footprint(tt):
        return (2 * C_in * tt * x_isz             # double-buffered activation tile
                + 2 * t_co * tt * o_isz           # double-buffered output tile
                + w_bufs * t_co * C_in * w_isz    # weight tile(s)
                + 2 * t_co * 4)                   # bias (tiny)

    # Shrink t to fit the budget, but keep DMA rows long (>= 512 lanes).
    t_floor = min(t, 512 if HW >= 512 else 128)
    while t > t_floor and _footprint(t) > budget:
        t -= 128
    t = _prefer_divisor_of(t, HW)
    # If it still doesn't fit, shrink the C_out tile rather than the pixel tile.
    while n_co > 1 and t_co > 256 and _footprint(t) > budget:
        t_co -= 256
        n_co = pl.cdiv(C_out, t_co)

    n_hw = pl.cdiv(HW, t)

    # Guarantee >= 2 parallel grid steps so both v7x TensorCores get work.
    if N * n_co * n_hw < 2 and HW >= 256:
        t_half = -(-((HW + 1) // 2) // 128) * 128
        if t_half >= HW:
            t_half = ((HW // 2) // 128) * 128
        if t_half >= 128:
            t = t_half
            n_hw = pl.cdiv(HW, t)

    grid = (N, n_co, n_hw)      # all axes independent -> fully parallel

    vmem_limit = int(min(limit_cap, max(32 << 20, _footprint(t) + (8 << 20))))

    cost = pl.CostEstimate(
        flops=2 * N * HW * C_in * C_out,
        transcendentals=0,
        bytes_accessed=(n_co * N * HW * C_in * x_isz     # x re-read per co tile
                        + N * HW * C_out * o_isz
                        + C_out * C_in * w_isz + C_out * 4),
    )

    w_kw = dict(pipeline_mode=pl.Buffered(1)) if single_buffer_consts else {}
    b_kw = dict(pipeline_mode=pl.Buffered(1)) if single_buffer_consts else {}

    out = pl.pallas_call(
        _conv1x1_kernel,
        out_shape=jax.ShapeDtypeStruct((N, C_out, HW), out_dtype),
        grid_spec=pltpu.PrefetchScalarGridSpec(
            num_scalar_prefetch=0,
            grid=grid,
            in_specs=[
                # (batch squeezed, all input channels, one pixel tile)
                pl.BlockSpec((None, C_in, t), lambda n, co, i: (n, 0, i)),
                # weight tile: constant across the (inner) pixel axis
                pl.BlockSpec((t_co, C_in), lambda n, co, i: (co, 0), **w_kw),
                pl.BlockSpec((t_co, 1), lambda n, co, i: (co, 0), **b_kw),
            ],
            out_specs=pl.BlockSpec((None, t_co, t), lambda n, co, i: (n, co, i)),
        ),
        compiler_params=pltpu.CompilerParams(
            dimension_semantics=("parallel", "parallel", "parallel"),
            vmem_limit_bytes=vmem_limit,
        ),
        cost_estimate=cost,
    )(x, w, b)

    # Free reshape back to NCHW.
    return out.reshape(N, C_out, H, W)


def init_conv_connector_params(key, in_channels, out_channels, dtype=jnp.float32):
    """Deterministic synthetic init mimicking nn.Conv2d(k=1) parameter shapes."""
    k_w, k_b = jax.random.split(key)
    fan_in = in_channels  # kernel_size = 1
    bound = 1.0 / jnp.sqrt(fan_in)
    weight = jax.random.uniform(k_w, (out_channels, in_channels),
                                minval=-bound, maxval=bound, dtype=dtype)
    bias = jax.random.uniform(k_b, (out_channels,),
                              minval=-bound, maxval=bound, dtype=dtype)
    return weight, bias


if __name__ == "__main__":
    key = jax.random.PRNGKey(0)
    k_x, k_p = jax.random.split(key)

    N, C, H, W = 2, 4, 16, 16  # in_channels == out_channels per BaseConnector assert
    x = jax.random.normal(k_x, (N, C, H, W), dtype=jnp.float32)
    weight, bias = init_conv_connector_params(k_p, C, C)

    y = conv_connector_forward(x, weight, bias)
    jax.block_until_ready(y)

    # Reference check in plain JAX (1x1 conv == channel matmul).
    y_ref = jnp.einsum("nchw,oc->nohw", x, weight) + bias[None, :, None, None]
    assert y.shape == (N, C, H, W)
    assert jnp.allclose(y, y_ref, atol=1e-5, rtol=1e-5)

    print("KERNEL_OK")
</pallas_src>

<mosaic_0001>
module attributes {stable_mosaic.version = 11 : i64} {
  func.func @_conv1x1_kernel(%arg0: i32, %arg1: i32, %arg2: i32, %arg3: memref<1x4x256xf32, #tpu.memory_space<vmem>>, %arg4: memref<4x4xf32, #tpu.memory_space<vmem>>, %arg5: memref<4x1xf32, #tpu.memory_space<vmem>>, %arg6: memref<1x4x256xf32, #tpu.memory_space<vmem>>) attributes {dimension_semantics = [#tpu.dimension_semantics<parallel>, #tpu.dimension_semantics<parallel>, #tpu.dimension_semantics<parallel>], iteration_bounds = array<i64: 2, 1, 1>, scalar_prefetch = 0 : i64, scratch_operands = 0 : i64, tpu.core_type = #tpu.core_type<tc>, window_params = [{transform_indices = @transform_0, window_bounds = array<i64: 1, 4, 256>}, {transform_indices = @transform_1, window_bounds = array<i64: 4, 4>}, {transform_indices = @transform_2, window_bounds = array<i64: 4, 1>}, {transform_indices = @transform_3, window_bounds = array<i64: 1, 4, 256>}]} {
    %c0 = arith.constant 0 : index
    %c0_0 = arith.constant 0 : index
    %0 = vector.load %arg4[%c0, %c0_0] : memref<4x4xf32, #tpu.memory_space<vmem>>, vector<4x4xf32>
    %c0_1 = arith.constant 0 : index
    %c0_2 = arith.constant 0 : index
    %c0_3 = arith.constant 0 : index
    %1 = vector.load %arg3[%c0_1, %c0_2, %c0_3] : memref<1x4x256xf32, #tpu.memory_space<vmem>>, vector<1x4x256xf32>
    %2 = vector.shape_cast %1 : vector<1x4x256xf32> to vector<4x256xf32>
    %cst = arith.constant dense<0.000000e+00> : vector<4x256xf32>
    %3 = tpu.matmul %0, %2, %cst {dimension_numbers = #tpu.dot_dimension_numbers<[1], [0], [0], [1], [0, 0, 1, 1], [], []>} : vector<4x4xf32>, vector<4x256xf32>, vector<4x256xf32> -> vector<4x256xf32>
    %c0_4 = arith.constant 0 : index
    %c0_5 = arith.constant 0 : index
    %4 = vector.load %arg5[%c0_4, %c0_5] : memref<4x1xf32, #tpu.memory_space<vmem>>, vector<4x1xf32>
    %5 = vector.broadcast %4 : vector<4x1xf32> to vector<4x256xf32>
    %6 = arith.addf %3, %5 : vector<4x256xf32>
    %c0_6 = arith.constant 0 : index
    %c0_7 = arith.constant 0 : index
    %c0_8 = arith.constant 0 : index
    %7 = vector.load %arg6[%c0_6, %c0_7, %c0_8] : memref<1x4x256xf32, #tpu.memory_space<vmem>>, vector<1x4x256xf32>
    %8 = vector.shape_cast %7 : vector<1x4x256xf32> to vector<4x256xf32>
    %9 = vector.shape_cast %6 : vector<4x256xf32> to vector<1x4x256xf32>
    tpu.vector_store %arg6[%c0_6, %c0_7, %c0_8], %9 {strides = array<i32>} : memref<1x4x256xf32, #tpu.memory_space<vmem>>, vector<1x4x256xf32>,
    return
  }
  func.func @transform_0(%arg0: i32, %arg1: i32, %arg2: i32) -> (i32, i32, i32) {
    %c0_i32 = arith.constant 0 : i32
    %c0_i32_0 = arith.constant 0 : i32
    return %arg0, %c0_i32, %arg2 : i32, i32, i32
  }
  func.func @transform_1(%arg0: i32, %arg1: i32, %arg2: i32) -> (i32, i32) {
    %c0_i32 = arith.constant 0 : i32
    %c0_i32_0 = arith.constant 0 : i32
    return %arg1, %c0_i32 : i32, i32
  }
  func.func @transform_2(%arg0: i32, %arg1: i32, %arg2: i32) -> (i32, i32) {
    %c0_i32 = arith.constant 0 : i32
    %c0_i32_0 = arith.constant 0 : i32
    return %arg1, %c0_i32 : i32, i32
  }
  func.func @transform_3(%arg0: i32, %arg1: i32, %arg2: i32) -> (i32, i32, i32) {
    %c0_i32 = arith.constant 0 : i32
    return %arg0, %arg1, %arg2 : i32, i32, i32
  }
}

</mosaic_0001>

<bundles_post_ra>
// kernel: tpu_custom_call.1
= control target key start
LH: loop header
LB: loop body
LE: loop exit
PB: predicated region body
PF: predicated region fallthrough
CT: control target
= control target key end

     0   :  { %8 = vsyncpa [#allocation3], 0  ;;  %s845_s0 = inlined_call_operand.hbm [shape: f32[2,4,256], index: 0, kind: input, shape index: {}]   ;;  %s846_s1 = inlined_call_operand.vmem [shape: f32[4,4], index: 1, kind: input, shape index: {}]   ;;  %s847_s2 = inlined_call_operand.vmem [shape: f32[4,1], index: 2, kind: input, shape index: {}]   ;;  %s848_s3 = inlined_call_operand.hbm [shape: f32[2,4,256], index: 3, kind: output, shape index: {}]  }
   0x1   :  { %10 = vsyncpa [#allocation3 + $0x1], 0 }
   0x2   :  { %11 = vsyncpa [#allocation4], 0 }
   0x3   :  { %13 = vsyncpa [#allocation4 + $0x1], 0  ;;  %s705_s12 = smov 0   ;;  %s707_s13 = smov 0  }
   0x4   :  { %s709_s14 = smov 0   ;;  %s711_s15 = smov 0  }
   0x5   :  { %s713_s16 = smov 0   ;;  %s715_s17 = smov 0  }
   0x6 LB: > { %s483_s18 = sadd.s32 4294967295, %s679_s17   ;;  %s484_s19 = sadd.s32 4294967294, %s679_s17   ;;  %s679_s17 = sphi %s715_s17, %s19_s17   ;;  %s675_s16 = sphi %s713_s16, %s860_s16   ;;  %s671_s15 = sphi %s711_s15, %s859_s15   ;;  %s667_s14 = sphi %s709_s14, %s858_s14   ;;  %s663_s13 = sphi %s707_s13, %s857_s13   ;;  %s659_s12 = sphi %s705_s12, %s856_s12  }
   0x7   : > { %s38_s20 = sadd.s32 1, %s675_s16  ;;  %s47_s21 = sadd.s32 1, %s667_s14 }
   0x8   : > { %p40_p0 = scmp.ge.s32.totalorder %s38_s20, 2  ;;  %p54_p1 = scmp.ne.s32.totalorder %s667_s14, %s663_s13 }
   0x9   : > { %p55_p2 = scmp.eq.s32.totalorder %s679_s17, 0  ;;  %p60_p3 = scmp.ne.s32.totalorder %s663_s13, %s659_s12 }
   0xa   : > { %s862_s20 = smov (%p40_p0, %s38_s20), 0  ;;  %p61_p5 = scmp.eq.s32.totalorder %s483_s18, 0 }
   0xb   : > { %p746_p4 = por %p55_p2, %p54_p1  ;;  %s42_s23 = ssub.s32 %s675_s16, %s862_s20 }
   0xc   : > { %p140_p6 = scmp.eq.s32.totalorder %s483_s18, 1  ;;  %p45_p7 = scmp.eq.s32.totalorder %s42_s23, 0 }
   0xd   : > { %p752_p8 = por %p61_p5, %p60_p3  ;;  %p146_p10 = scmp.eq.s32.totalorder %s484_s19, 1 }
   0xe   : > { %p756_p9 = por %p140_p6, %p54_p1  ;;  %p517_p13 = scmp.lt.s32.totalorder %s679_s17, 2 }
   0xf   : > { %s761_s26 = scalar_select %p45_p7, %s667_s14, %s47_s21  }
  0x10   : > { %p763_p11 = por %p146_p10, %p60_p3  ;;  %s180_s28 = sand.u32 1, %s667_s14  }
  0x11   : > { %s489_s29 = sshll.u32 %s180_s28, 3  ;;  %s503_s30 = sshll.u32 %s675_s16, 7 }
  0x12   : > { %s852_s27 = scalar_select %p763_p11, 1, 0 }
  0x13   : > { %s192_s6 = scalar_lea.hbm %s845_s0, %s503_s30  ;;  %s184_s7 = scalar_lea.vmem [#allocation2], %s489_s29 }
  0x14   : > { %s194_s8 = sshll.u32 %s184_s7, 4  ;;  %p776_p0 = pnand %p517_p13, %p746_p4  ;;  %s195_s8 = int_to_ptr.vmem [resolvable:$true] %s194_s8 }
  0x15   : > { %p492_p1 = scmp.ge.s32.totalorder %s679_s17, 1  ;;  %p199_p2 = scmp.lt.s32.totalorder %s679_s17, 3 }
  0x16   : > { %s181_s10 = scalar_lea.sflag [#allocation3], %s180_s28  ;;  %p573_p3 = pneg %p776_p0 }
  0x17   : > { %s584_s11 = scalar_lea.vmem %s195_s8, 128  ;;  %s681_s18 = smov [#allocation2]  }
  0x18   : > { %p585_p5 = scmp.ne.s32.totalorder %s195_s8, %s584_s11  ;;  %s589_s19 = sshll.u32 %s681_s18, 4  ;;  %s590_s19 = int_to_ptr.vmem [resolvable:$false] %s589_s19 }
  0x19   : > { %s591_s21 = scalar_lea.vmem %s590_s19, 256  ;;  %p592_p10 = scmp.lt.s32.totalorder %s195_s8, %s590_s19 }
  0x1a   : > { %p587_p6 = pnand %p585_p5, %p573_p3  ;;  %p593_p12 = scmp.lt.s32.totalorder %s591_s21, %s584_s11 }
  0x1c   : > { %p588_p7 = pneg %p587_p6  ;;  %p594_p4 = por %p593_p12, %p592_p10 }
  0x1e   : > { %p595_p13 = pnand %p594_p4, %p588_p7 }
  0x20   : > { %598 = shalt.err (!%p595_p13)
}
  0x21   : > { %512 = dma.hbm_to_vmem [thread:$0]  (!%p776_p0), %s192_s6, 128, %s195_s8, %s181_s10  }
  0x22   : > { %p200_p11 = pnand %p492_p1, %p199_p2 }
  0x23   : > { %s791_s22 = sand.u32 (!%p200_p11), 1, %s663_s13  }
  0x24   : > { %203 = sbr.rel (%p200_p11) target bundleno = 259 (0x103), region = 32  ;;  %s493_s23 = sshll.u32 (!%p200_p11), %s791_s22, 3 }
  0x25   : > { %s206_s28 = scalar_lea.sflag (!%p200_p11), [#allocation3], %s791_s22  ;;  %s209_s29 = scalar_lea.vmem (!%p200_p11), [#allocation2], %s493_s23 }
  0x29   : > { %650 = dma.done.wait (%p752_p8), %s206_s28, 128  }
  0x2a   : > { %652 = vsyncadd (%p752_p8), %s206_s28, 4294967168  ;;  %v682_v0 = vmov 0.0   ;;  %v683_v1 = vmov 0   ;;  %v251_v2 = vld [vmem:[%s209_s29] sm:$0xff]  ;;  %vm264_vm0 = vcmask 1043456   ;;  %vm260_vm1 = vcmask 31744  }
  0x2b   : > { %333 = vmatprep.mubr.f32.mxu0 %v682_v0  ;;  %569 = vset.pattern.permute.xlu0 %v683_v1  ;;  %v252_v3 = vld [vmem:[%s847_s2] sm:$0xf]  ;;  %v259_v4 = vcombine.high %v251_v2, %v251_v2  ;;  %s504_s24 = sshll.u32 %s671_s15, 7  ;;  %s239_s7 = scalar_lea.vmem [#allocation5], %s493_s23 }
  0x2c   : > { %255 = vperm.xlu0 %569, %v252_v3   ;;  %v250_v5 = vld [vmem:[%s846_s1] sm:$0xf]  ;;  %s364_s8 = sshll.u32 %s239_s7, 4  ;;  %s362_s11 = scalar_lea.hbm %s848_s3, %s504_s24  ;;  %s365_s8 = int_to_ptr.vmem [resolvable:$true] %s364_s8 }
  0x2d   : > { %495 = vmatprep.subr.msk.mxu0 %vm264_vm0, %v259_v4  ;;  %s346_s18 = scalar_lea.sflag [#allocation4], %s791_s22  ;;  %s599_s19 = scalar_lea.vmem %s365_s8, 128 }
  0x2e   : > { %496 = vmatpush1.msk.msra.mxu0 %vm264_vm0, %v251_v2  ;;  %p600_p8 = scmp.ne.s32.totalorder %s365_s8, %s599_s19  ;;  %s684_s21 = smov [#allocation5]  }
  0x2f   : > { %497 = vmatmul.mubr.msk.f32.vlgmr.msra.gmra.mxu0 %vm260_vm1, %v250_v5  ;;  %s603_s28 = sshll.u32 %s684_s21, 4  ;;  %s604_s28 = int_to_ptr.vmem [resolvable:$false] %s603_s28 }
  0x30   : > { %p601_p11 = pnand %p600_p8, %p756_p9  ;;  %s605_s15 = scalar_lea.vmem %s604_s28, 256 }
  0x31   : > { %p606_p0 = scmp.lt.s32.totalorder %s365_s8, %s604_s28  ;;  %p607_p1 = scmp.lt.s32.totalorder %s605_s15, %s599_s19 }
  0x32   : > { %p602_p12 = pneg %p601_p11 }
  0x33   : > { %p608_p2 = por %p607_p1, %p606_p0 }
  0x35   : > { %p609_p3 = pnand %p608_p2, %p602_p12 }
  0xa7   : > { %v256_v6 = vpop.permute.xlu0 %255 }
  0xef   : > { %v335_v7 = vpop.f32.mrf.mxu0 }
  0xf0   : > { %v336_v9 = vadd.f32 %v335_v7, %v256_v6 }
  0xf1   : > { %v337_v8 = vpop.f32.mrf.mxu0 }
  0xf2   : > { %v338_v10 = vadd.f32 %v337_v8, %v256_v6 }
  0xf4   : > { %v342_v11 = vcombine.low %v336_v9, %v338_v10 }
  0xf6   : > { %344 = vst [vmem:[%s239_s7] sm:$0xff] %v342_v11 }
  0xf7   : > { %612 = shalt.err (!%p609_p3)
}
  0xf8   : > { %s613_s23 = scalar_lea.hbm %s362_s11, 128  ;;  %s617_s30 = scalar_lea.hbm %s848_s3, 256 }
  0xf9   : > { %p614_p5 = scmp.ne.s32.totalorder %s362_s11, %s613_s23  ;;  %p618_p10 = scmp.lt.s32.totalorder %s362_s11, %s848_s3 }
  0xfa   : > { %p619_p4 = scmp.lt.s32.totalorder %s617_s30, %s613_s23 }
  0xfb   : > { %p615_p6 = pnand %p614_p5, %p756_p9 }
  0xfc   : > { %p620_p13 = por %p619_p4, %p618_p10 }
  0xfd   : > { %p616_p7 = pneg %p615_p6 }
  0xff   : > { %p621_p8 = pnand %p620_p13, %p616_p7 }
 0x101   : > { %624 = shalt.err (!%p621_p8)
}
 0x102   : > { %507 = dma.vmem_to_hbm [thread:$0]  (%p756_p9), %s365_s8, 128, %s362_s11, %s346_s18  }
 0x103 PF: > { %s376_s6 = sand.u32 1, %s659_s12   ;;  %p854_p11 = scmp.ne.s32.totalorder %s852_s27, 0 }
 0x104   : > { %p855_p12 = scmp.ge.s32.totalorder %s679_s17, 2  ;;  %s377_s24 = scalar_lea.sflag [#allocation4], %s376_s6 }
 0x106   : > { %p514_p0 = pnand %p855_p12, %p854_p11 }
 0x108   : > { %p515_p1 = pneg %p514_p0 }
 0x10a   : > { %654 = dma.done.wait (%p515_p1), %s377_s24, 128  }
 0x10b   : > { %656 = vsyncadd (%p515_p1), %s377_s24, 4294967168  ;;  %s19_s17 = sadd.s32 1, %s679_s17   ;;  %s856_s12 = smov %s663_s13 }
 0x10c   : > { %p16_p2 = scmp.ge.s32.totalorder %s19_s17, 4   ;;  %s857_s13 = smov %s667_s14 }
 0x10d   : > { %s858_s14 = smov %s761_s26  ;;  %s859_s15 = smov %s675_s16 }
 0x10e   : > { %s860_s16 = smov %s862_s20  ;;  %18 = sbr.rel (!%p16_p2) target bundleno = 6 (0x6), region = 83 }
 0x113   :  { %382 = vsyncpa [#allocation3], 1 }
 0x114   :  { %384 = vsyncpa [#allocation3 + $0x1], 1 }
 0x115   :  { %385 = vsyncpa [#allocation4], 1 }
 0x116   :  { %387 = vsyncpa [#allocation4 + $0x1], 1 }

</bundles_post_ra>
